<compile_context>
chip_gen: v7x
topology: tpu7x:2x2x1
jax: 0.10.0
libtpu: 0.0.40
codegen_flags: <defaults>
</compile_context>

<pallas_src>
import functools

import jax
import jax.numpy as jnp
from jax.experimental import pallas as pl
from jax.experimental.pallas import tpu as pltpu

ALPHA = 0.25
GAMMA = 4          # static python int -> integer_pow (2 VPU muls), no extra EUP work
LANES = 128        # vreg lane width
SUBLANES = 8       # vreg sublane width (f32)
ROW_TILE = 2048    # rows per input block in the tiled path

# Padding pair with exactly-zero focal loss: bce(30, 1) = log1p(exp(-30)),
# p_t rounds to 1.0 in f32, so (1 - p_t)**gamma == 0 and fl == 0.
NEUTRAL_X = 30.0
NEUTRAL_T = 1.0


def _focal_elementwise(x, t, alpha, gamma):
    x = x.astype(jnp.float32)
    t = t.astype(jnp.float32)
    # Numerically-stable BCE-with-logits (torch formulation).
    bce = jnp.maximum(x, 0.0) - x * t + jnp.log1p(jnp.exp(-jnp.abs(x)))
    p_t = jnp.exp(-bce)
    # NOTE: for strictly-binary targets one exp/element could be folded into
    # exp(-|x|); kept fully general to match the torch module (soft targets).
    return alpha * (1.0 - p_t) ** gamma * bce


def _single_block_kernel(x_ref, t_ref, out_ref, *, alpha, gamma, total):
    """Whole input resident in VMEM: compute, reduce, divide. No grid phases."""
    fl = _focal_elementwise(x_ref[...], t_ref[...], alpha, gamma)
    out_ref[...] = jnp.sum(fl, keepdims=True) / jnp.float32(total)


def _tiled_kernel(x_ref, t_ref, out_ref, *, alpha, gamma):
    """Grid (P, R): accumulate each partition's sum into its resident (8,128)
    output block; only VPU adds per step, no per-step cross-lane reduce."""
    r = pl.program_id(1)

    @pl.when(r == 0)
    def _():
        out_ref[...] = jnp.zeros_like(out_ref)

    fl = _focal_elementwise(x_ref[...], t_ref[...], alpha, gamma)
    # (ROW_TILE, 128) -> (ROW_TILE/8, 8, 128): regroups whole f32 vregs (no
    # tile-boundary crossing), then the axis-0 sum is elementwise vreg adds.
    out_ref[...] += jnp.sum(
        fl.reshape(ROW_TILE // SUBLANES, SUBLANES, LANES), axis=0
    )


def _pad_flat(v, n, fill):
    pad = n - v.shape[0]
    if pad > 0:
        v = jnp.concatenate([v, jnp.full((pad,), fill, dtype=v.dtype)])
    return v


def focal_loss(inputs, targets, alpha=ALPHA, gamma=GAMMA):
    """inputs/targets: float arrays of identical shape. Returns scalar f32 mean."""
    assert inputs.shape == targets.shape
    assert isinstance(gamma, int), "gamma must be a static int (integer_pow)"
    total = inputs.size

    x = inputs.reshape(-1)
    t = targets.reshape(-1)
    m = -(-total // LANES)  # rows after lane padding

    if m <= ROW_TILE:
        # Tiny/medium input: single block, no grid machinery, no scratch.
        n = m * LANES
        x2d = _pad_flat(x, n, NEUTRAL_X).reshape(m, LANES)
        t2d = _pad_flat(t, n, NEUTRAL_T).reshape(m, LANES)
        kernel = functools.partial(
            _single_block_kernel, alpha=alpha, gamma=gamma, total=total
        )
        out = pl.pallas_call(
            kernel,
            out_shape=jax.ShapeDtypeStruct((1, 1), jnp.float32),
        )(x2d, t2d)
        return out[0, 0]

    # Tiled path.
    num_blocks = -(-m // ROW_TILE)
    parts = 2 if num_blocks >= 2 else 1      # megacore partitions (v7x: 2 TCs)
    r_steps = -(-num_blocks // parts)        # reduction steps per partition
    padded_m = parts * r_steps * ROW_TILE
    n = padded_m * LANES
    x2d = _pad_flat(x, n, NEUTRAL_X).reshape(padded_m, LANES)
    t2d = _pad_flat(t, n, NEUTRAL_T).reshape(padded_m, LANES)

    kernel = functools.partial(_tiled_kernel, alpha=alpha, gamma=gamma)
    in_map = lambda p, r: (p * r_steps + r, 0)

    partials = pl.pallas_call(
        kernel,
        out_shape=jax.ShapeDtypeStruct((parts * SUBLANES, LANES), jnp.float32),
        grid_spec=pltpu.PrefetchScalarGridSpec(
            num_scalar_prefetch=0,
            grid=(parts, r_steps),
            in_specs=[
                pl.BlockSpec((ROW_TILE, LANES), in_map),
                pl.BlockSpec((ROW_TILE, LANES), in_map),
            ],
            out_specs=pl.BlockSpec((SUBLANES, LANES), lambda p, r: (p, 0)),
        ),
        compiler_params=pltpu.CompilerParams(
            dimension_semantics=("parallel", "arbitrary"),
        ),
    )(x2d, t2d)
    # Single cross-lane/sublane reduce over the tiny partials, then the mean.
    return jnp.sum(partials) / jnp.float32(total)


def focal_loss_ref(inputs, targets, alpha=ALPHA, gamma=GAMMA):
    x = inputs.astype(jnp.float32)
    t = targets.astype(jnp.float32)
    bce = jnp.maximum(x, 0.0) - x * t + jnp.log1p(jnp.exp(-jnp.abs(x)))
    p_t = jnp.exp(-bce)
    fl = alpha * (1.0 - p_t) ** gamma * bce
    return jnp.mean(fl)


if __name__ == "__main__":
    key = jax.random.PRNGKey(0)
    k1, k2, k3, k4 = jax.random.split(key, 4)

    # --- Small demo size (single-block path): NCHW (2, 4, 16, 16) ---
    x_small = jax.random.normal(k1, (2, 4, 16, 16), dtype=jnp.float32) * 2.0
    t_small = jax.random.bernoulli(k2, p=0.3, shape=(2, 4, 16, 16)).astype(jnp.float32)

    out_small = jax.block_until_ready(focal_loss(x_small, t_small))
    ref_small = focal_loss_ref(x_small, t_small)
    assert jnp.allclose(out_small, ref_small, rtol=1e-5, atol=1e-6), (out_small, ref_small)

    # --- Larger size (tiled path: parallel axis, accumulation, padding) ---
    x_big = jax.random.normal(k3, (2, 3, 321, 200), dtype=jnp.float32) * 2.0
    t_big = jax.random.bernoulli(k4, p=0.3, shape=(2, 3, 321, 200)).astype(jnp.float32)

    out_big = jax.block_until_ready(focal_loss(x_big, t_big))
    ref_big = focal_loss_ref(x_big, t_big)
    assert jnp.allclose(out_big, ref_big, rtol=5e-5, atol=1e-8), (out_big, ref_big)

    print("KERNEL_OK")
</pallas_src>

<mosaic_0001>
module attributes {stable_mosaic.version = 11 : i64} {
  func.func @_single_block_kernel(%arg0: memref<16x128xf32, #tpu.memory_space<vmem>>, %arg1: memref<16x128xf32, #tpu.memory_space<vmem>>, %arg2: memref<1x1xf32, #tpu.memory_space<vmem>>) attributes {dimension_semantics = [], scalar_prefetch = 0 : i64, scratch_operands = 0 : i64, tpu.core_type = #tpu.core_type<tc>} {
    %c0 = arith.constant 0 : index
    %c0_0 = arith.constant 0 : index
    %0 = vector.load %arg0[%c0, %c0_0] : memref<16x128xf32, #tpu.memory_space<vmem>>, vector<16x128xf32>
    %c0_1 = arith.constant 0 : index
    %c0_2 = arith.constant 0 : index
    %1 = vector.load %arg1[%c0_1, %c0_2] : memref<16x128xf32, #tpu.memory_space<vmem>>, vector<16x128xf32>
    %cst = arith.constant 0.000000e+00 : f32
    %2 = vector.broadcast %cst : f32 to vector<16x128xf32>
    %3 = arith.maximumf %0, %2 : vector<16x128xf32>
    %4 = arith.mulf %0, %1 : vector<16x128xf32>
    %5 = arith.subf %3, %4 : vector<16x128xf32>
    %6 = math.absf %0 : vector<16x128xf32>
    %cst_3 = arith.constant 0.000000e+00 : f32
    %7 = vector.broadcast %cst_3 : f32 to vector<16x128xf32>
    %8 = arith.subf %7, %6 : vector<16x128xf32>
    %9 = math.exp %8 : vector<16x128xf32>
    %10 = math.log1p %9 : vector<16x128xf32>
    %11 = arith.addf %5, %10 : vector<16x128xf32>
    %cst_4 = arith.constant 0.000000e+00 : f32
    %12 = vector.broadcast %cst_4 : f32 to vector<16x128xf32>
    %13 = arith.subf %12, %11 : vector<16x128xf32>
    %14 = math.exp %13 : vector<16x128xf32>
    %cst_5 = arith.constant 1.000000e+00 : f32
    %15 = vector.broadcast %cst_5 : f32 to vector<16x128xf32>
    %16 = arith.subf %15, %14 : vector<16x128xf32>
    %17 = arith.mulf %16, %16 : vector<16x128xf32>
    %18 = arith.mulf %17, %17 : vector<16x128xf32>
    %cst_6 = arith.constant 2.500000e-01 : f32
    %19 = vector.broadcast %cst_6 : f32 to vector<16x128xf32>
    %20 = arith.mulf %19, %18 : vector<16x128xf32>
    %21 = arith.mulf %20, %11 : vector<16x128xf32>
    %22 = vector.shape_cast %21 : vector<16x128xf32> to vector<1x16x128xf32>
    %cst_7 = arith.constant dense<0.000000e+00> : vector<1xf32>
    %23 = vector.multi_reduction <add>, %22, %cst_7 [1, 2] : vector<1x16x128xf32> to vector<1xf32>
    %24 = vector.shape_cast %23 : vector<1xf32> to vector<1x1x1xf32>
    %25 = vector.extract %24[0, 0, 0] : f32 from vector<1x1x1xf32>
    %26 = vector.broadcast %25 : f32 to vector<1x1xf32>
    %cst_8 = arith.constant 2.048000e+03 : f32
    %27 = vector.broadcast %cst_8 : f32 to vector<1x1xf32>
    %28 = arith.divf %26, %27 : vector<1x1xf32>
    %c0_9 = arith.constant 0 : index
    %c0_10 = arith.constant 0 : index
    %29 = vector.load %arg2[%c0_9, %c0_10] : memref<1x1xf32, #tpu.memory_space<vmem>>, vector<1x1xf32>
    tpu.vector_store %arg2[%c0_9, %c0_10], %28 {strides = array<i32>} : memref<1x1xf32, #tpu.memory_space<vmem>>, vector<1x1xf32>,
    return
  }
}

</mosaic_0001>

<bundles_post_ra>
// kernel: tpu_custom_call.1
= control target key start
LH: loop header
LB: loop body
LE: loop exit
PB: predicated region body
PF: predicated region fallthrough
CT: control target
= control target key end

     0   :  { %7 = vsyncpa [#allocation3], 0  ;;  %s272_s0 = inlined_call_operand.hbm [shape: f32[16,128], index: 0, kind: input, shape index: {}]   ;;  %s273_s1 = inlined_call_operand.hbm [shape: f32[16,128], index: 1, kind: input, shape index: {}]   ;;  %s274_s2 = inlined_call_operand.hbm [shape: f32[1,1], index: 2, kind: output, shape index: {}]  }
   0x1   :  { %8 = vsyncpa [#allocation6], 0 }
   0x2   :  { %9 = vsyncpa [#allocation4], 0  ;;  %s216_s9 = smov [#allocation2]   ;;  %s144_s13 = scalar_lea.hbm %s272_s0, 256 }
   0x3   :  { %s15_s10 = sshll.u32 %s216_s9, 4  ;;  %p145_p0 = scmp.ne.s32.totalorder %s272_s0, %s144_s13  ;;  %s16_s10 = int_to_ptr.vmem [resolvable:$true] %s15_s10 }
   0x4   :  { %p148_p1 = scmp.lt.u32.totalorder %s144_s13, %s272_s0 }
   0x6   :  { %p150_p2 = pnand %p148_p1, %p145_p0 }
   0x8   :  { %153 = shalt.err (!%p150_p2)
}
   0x9   :  { %s154_s18 = scalar_lea.vmem %s16_s10, 256  ;;  %p159_p4 = scmp.lt.s32.totalorder %s16_s10, %s16_s10 }
   0xa   :  { %p155_p3 = scmp.ne.s32.totalorder %s16_s10, %s154_s18  ;;  %p160_p5 = scmp.lt.s32.totalorder %s154_s18, %s154_s18 }
   0xc   :  { %p161_p6 = por %p160_p5, %p159_p4 }
   0xe   :  { %p162_p7 = pnand %p161_p6, %p155_p3 }
  0x10   :  { %165 = shalt.err (!%p162_p7)
}
  0x11   :  { %s217_s19 = smov 128   ;;  %s218_s20 = smov 8  }
  0x12   :  { %21 = dma.hbm_to_vmem [thread:$0]  %s272_s0, 256, %s16_s10, [#allocation3], %s217_s19, %s217_s19, %s218_s20  }
  0x13   :  { %s219_s23 = smov [#allocation5]   ;;  %s166_s27 = scalar_lea.hbm %s273_s1, 256 }
  0x14   :  { %s27_s24 = sshll.u32 %s219_s23, 4  ;;  %p167_p8 = scmp.ne.s32.totalorder %s273_s1, %s166_s27  ;;  %s28_s24 = int_to_ptr.vmem [resolvable:$true] %s27_s24 }
  0x15   :  { %p170_p9 = scmp.lt.u32.totalorder %s166_s27, %s273_s1 }
  0x17   :  { %p172_p10 = pnand %p170_p9, %p167_p8 }
  0x19   :  { %175 = shalt.err (!%p172_p10)
}
  0x1a   :  { %s176_s4 = scalar_lea.vmem %s28_s24, 256  ;;  %p181_p12 = scmp.lt.s32.totalorder %s28_s24, %s28_s24 }
  0x1b   :  { %p177_p11 = scmp.ne.s32.totalorder %s28_s24, %s176_s4  ;;  %p182_p13 = scmp.lt.s32.totalorder %s176_s4, %s176_s4 }
  0x1d   :  { %p183_p0 = por %p182_p13, %p181_p12 }
  0x1f   :  { %p184_p1 = pnand %p183_p0, %p177_p11 }
  0x21   :  { %187 = shalt.err (!%p184_p1)
}
  0x22   :  { %33 = dma.hbm_to_vmem [thread:$0]  %s273_s1, 256, %s28_s24, [#allocation6], %s217_s19, %s217_s19, %s218_s20  }
  0x23   :  { %210 = dma.done.wait [#allocation3], 256  }
  0x24   :  { %211 = vsyncadd [#allocation3], 4294967040 }
  0x25   :  { %212 = dma.done.wait [#allocation6], 256  }
  0x26   :  { %213 = vsyncadd [#allocation6], 4294967040  ;;  %v40_v0 = vld [vmem:[#allocation2] sm:$0xff]  ;;  %v41_v1 = vld [vmem:[#allocation2 + $0x8] sm:$0xff]  ;;  %s220_s1 = smov [#allocation7]   ;;  %vm107_vm2 = vcmask 0  }
  0x27   :  { %v50_v2 = vand.u32 2147483647, %v40_v0  ;;  %v51_v3 = vand.u32 2147483647, %v41_v1  ;;  %v42_v14 = vld [vmem:[#allocation5] sm:$0xff]  ;;  %v43_v15 = vld [vmem:[#allocation5 + $0x8] sm:$0xff] }
  0x28   :  { %v44_v17 = vmax.f32 %v40_v0, 0.0  ;;  %v46_v18 = vmul.f32 %v42_v14, %v40_v0  ;;  %v45_v21 = vmax.f32 %v41_v1, 0.0  ;;  %v47_v22 = vmul.f32 %v43_v15, %v41_v1  ;;  %s115_s6 = sshll.u32 %s220_s1, 4  ;;  %s116_s6 = int_to_ptr.vmem [resolvable:$true] %s115_s6 }
  0x29   :  { %v52_v4 = vsub.f32 0.0, %v50_v2  ;;  %v53_v5 = vsub.f32 0.0, %v51_v3  ;;  %s188_s8 = scalar_lea.vmem %s116_s6, 16  ;;  %s192_s9 = scalar_lea.vmem %s116_s6, 32 }
  0x2a   :  { %v48_v26 = vsub.f32 %v44_v17, %v46_v18  ;;  %v49_v29 = vsub.f32 %v45_v21, %v47_v22  ;;  %p189_p2 = scmp.ne.s32.totalorder %s116_s6, %s188_s8  ;;  %p193_p3 = scmp.lt.s32.totalorder %s116_s6, %s116_s6 }
  0x2b   :  { %v54_v6 = vmul.f32 1.442695, %v52_v4  ;;  %v56_v7 = vmul.f32 1.442695, %v53_v5  ;;  %p194_p4 = scmp.lt.s32.totalorder %s192_s9, %s188_s8 }
  0x2d   :  { %132 = vpow2.f32 %v54_v6  ;;  %p195_p5 = por %p194_p4, %p193_p3 }
  0x2e   :  { %134 = vpow2.f32 %v56_v7 }
  0x2f   :  { %p196_p6 = pnand %p195_p5, %p189_p2 }
  0x37   :  { %v133_v8 = vpop.eup %132 }
  0x38   :  { %v135_v9 = vpop.eup %134  ;;  %v58_v10 = vadd.f32 1.0, %v133_v8  ;;  %v61_v12 = vmul.f32 -0.5, %v133_v8  ;;  %v64_v19 = vand.u32 2147483647, %v133_v8 }
  0x39   :  { %v67_v11 = vadd.f32 1.0, %v135_v9  ;;  %v70_v13 = vmul.f32 -0.5, %v135_v9  ;;  %v73_v23 = vand.u32 2147483647, %v135_v9 }
  0x3a   :  { %136 = vlog2.f32 %v58_v10  ;;  %v62_v16 = vadd.f32 1.0, %v61_v12  ;;  %vm65_vm0 = vcmp.lt.f32.partialorder %v64_v19, 0.0004427343 }
  0x3b   :  { %138 = vlog2.f32 %v67_v11  ;;  %v71_v20 = vadd.f32 1.0, %v70_v13  ;;  %vm74_vm1 = vcmp.lt.f32.partialorder %v73_v23, 0.0004427343 }
  0x3c   :  { %v63_v24 = vmul.f32 %v133_v8, %v62_v16 }
  0x3d   :  { %v72_v27 = vmul.f32 %v135_v9, %v71_v20 }
  0x44   :  { %v137_v25 = vpop.eup %136 }
  0x45   :  { %v139_v28 = vpop.eup %138  ;;  %v60_v30 = vmul.f32 0.6931472, %v137_v25 }
  0x46   :  { %v69_v31 = vmul.f32 0.6931472, %v139_v28 }
  0x47   :  { %v66_v32 = vsel %vm65_vm0, %v63_v24, %v60_v30 }
  0x48   :  { %v75_v33 = vsel %vm74_vm1, %v72_v27, %v69_v31  ;;  %v76_v34 = vadd.f32 %v66_v32, %v48_v26 }
  0x49   :  { %v77_v35 = vadd.f32 %v75_v33, %v49_v29 }
  0x4a   :  { %v78_v36 = vsub.f32 0.0, %v76_v34 }
  0x4b   :  { %v79_v37 = vsub.f32 0.0, %v77_v35 }
  0x4c   :  { %v80_v38 = vmul.f32 1.442695, %v78_v36 }
  0x4d   :  { %v82_v39 = vmul.f32 1.442695, %v79_v37 }
  0x4e   :  { %140 = vpow2.f32 %v80_v38 }
  0x4f   :  { %142 = vpow2.f32 %v82_v39 }
  0x58   :  { %v141_v40 = vpop.eup %140 }
  0x59   :  { %v143_v41 = vpop.eup %142  ;;  %v84_v42 = vsub.f32 1.0, %v141_v40 }
  0x5a   :  { %v85_v43 = vsub.f32 1.0, %v143_v41 }
  0x5b   :  { %v86_v44 = vmul.f32 %v84_v42, %v84_v42 }
  0x5c   :  { %v87_v45 = vmul.f32 %v85_v43, %v85_v43 }
  0x5d   :  { %v88_v46 = vmul.f32 %v86_v44, %v86_v44 }
  0x5e   :  { %v89_v47 = vmul.f32 %v87_v45, %v87_v45 }
  0x5f   :  { %v90_v48 = vmul.f32 0.25, %v88_v46 }
  0x60   :  { %v91_v49 = vmul.f32 0.25, %v89_v47 }
  0x61   :  { %v92_v50 = vmul.f32 %v90_v48, %v76_v34 }
  0x62   :  { %v93_v51 = vmul.f32 %v91_v49, %v77_v35 }
  0x64   :  { %v94_v52 = vadd.f32 %v93_v51, %v92_v50 }
  0x66   :  { %95 = vadd.xlane.f32.xlu0 %v94_v52 }
  0xf3   :  { %v96_v53 = vpop.xlane.xlu0 %95 }
  0xf4   :  { %v97_v54 = vrot.slane %v96_v53, 4 }
  0xf6   :  { %v98_v55 = vadd.f32 %v97_v54, %v96_v53 }
  0xf8   :  { %v99_v56 = vrot.slane %v98_v55, 2 }
  0xfa   :  { %v100_v57 = vadd.f32 %v99_v56, %v98_v55 }
  0xfc   :  { %v101_v58 = vrot.slane %v100_v57, 1 }
  0xfe   :  { %v102_v59 = vadd.f32 %v101_v58, %v100_v57 }
 0x100   :  { %125 = vpush %v102_v59 }
 0x131   :  { %s126_s7 = spop %125 }
 0x132   :  { %v104_v60 = vstv %s126_s7 }
 0x133   :  { %v106_v61 = vmul.f32 0.00048828125, %v104_v60 }
 0x135   :  { %108 = vst.msk [vmem:[#allocation7] sm:$0x1] %vm107_vm2, %v106_v61 }
 0x136   :  { %199 = shalt.err (!%p196_p6)
}
 0x137   :  { %s200_s12 = scalar_lea.hbm %s274_s2, 16 }
 0x138   :  { %p201_p7 = scmp.ne.s32.totalorder %s274_s2, %s200_s12  ;;  %p204_p8 = scmp.lt.u32.totalorder %s200_s12, %s274_s2 }
 0x13a   :  { %p206_p9 = pnand %p204_p8, %p201_p7 }
 0x13c   :  { %209 = shalt.err (!%p206_p9)
}
 0x13d   :  { %118 = dma.vmem_to_hbm [thread:$0]  %s116_s6, 16, %s274_s2, [#allocation4]  }
 0x13e   :  { %214 = dma.done.wait [#allocation4], 16  }
 0x13f   :  { %215 = vsyncadd [#allocation4], 4294967280 }
 0x140   :  { %122 = vsyncpa [#allocation3], 1 }
 0x141   :  { %123 = vsyncpa [#allocation6], 1 }
 0x142   :  { %124 = vsyncpa [#allocation4], 1 }

</bundles_post_ra>
